<compile_context>
chip_gen: v5e
topology: v5e:2x2
jax: 0.10.0
libtpu: 0.0.40
codegen_flags: <defaults>
</compile_context>

<pallas_src>
import functools

import jax
import jax.numpy as jnp
from jax.experimental import pallas as pl
from jax.experimental.pallas import tpu as pltpu


def _diffloss_kernel(pred_ref, true_ref, dl_ref, prev_p_ref, prev_t_ref, *,
                     threshold, T, Tt, inv_count, needs_mask):
    # Grid = (B, time_tiles); time is the reduction / carry axis (innermost).
    t_idx = pl.program_id(1)
    thr = jnp.float32(threshold)

    # Native-dtype load, f32 math.
    x = pred_ref[...].astype(jnp.float32)   # (Tt, C)
    y = true_ref[...].astype(jnp.float32)   # (Tt, C)

    @pl.when(t_idx == 0)
    def _():
        # Resident output block doubles as the accumulator.
        dl_ref[...] = jnp.zeros_like(dl_ref)
        # Prime the halo with this tile's own first row -> zero boundary diff
        # (threshold > 0 means a zero diff never counts as a disagreement).
        prev_p_ref[...] = x[0:1, :]
        prev_t_ref[...] = y[0:1, :]

    # Shift-by-one-row copies: row i holds the value of global row i-1
    # (row 0 holds the carried last row of the previous time tile).
    xp = jnp.concatenate([prev_p_ref[...], x[:-1, :]], axis=0)
    yp = jnp.concatenate([prev_t_ref[...], y[:-1, :]], axis=0)
    pd = x - xp
    td = y - yp

    # Direct disagreement predicate: signs exactly opposite (threshold > 0).
    dis = ((pd >= thr) & (td <= -thr)) | ((pd <= -thr) & (td >= thr))

    if needs_mask:
        # Last (partial) time tile: rows with global index >= T hold undefined
        # data from the padded block -> mask their contribution.
        row = jax.lax.broadcasted_iota(jnp.int32, (Tt, x.shape[-1]), 0) + t_idx * Tt
        dis = dis & (row < T)

    dl_ref[...] += jnp.sum(dis.astype(jnp.float32), axis=0, keepdims=True)

    # Carry the last row of this tile for the next tile's boundary diff.
    # (For the final, possibly partial, tile this carries garbage, but the
    #  next grid step re-primes at t==0 so it is never consumed.)
    prev_p_ref[...] = x[-1:, :]
    prev_t_ref[...] = y[-1:, :]

    @pl.when(t_idx == pl.num_programs(1) - 1)
    def _():
        dl_ref[...] = dl_ref[...] * jnp.float32(inv_count)


def diff_loss(pred, true, w_channel, threshold=0.005, *, time_tile=None):
    """Pallas implementation of DiffLoss.forward.

    pred, true : (B, T, C) — any float dtype (kept native; math in f32 in-kernel)
    w_channel  : (C,) float
    returns (w_channel * dl, dl), both (B, C) float32.
    """
    B, T, C = pred.shape
    assert true.shape == (B, T, C)
    assert w_channel.shape == (C,)
    assert threshold > 0.0  # predicate form assumes a strictly positive threshold

    w = w_channel.astype(jnp.float32)

    if T == 1:
        # TODO(synk): PyTorch's mean over an empty axis yields NaN; reproduce it
        # without lowering a degenerate (0-row-diff) kernel.
        dl = jnp.full((B, C), jnp.nan, dtype=jnp.float32)
        return w[None, :] * dl, dl

    itemsize = jnp.dtype(pred.dtype).itemsize

    # Time tile: ~4 MiB per input block (double-buffered inputs ~16 MiB live),
    # multiple of 8 sublanes, or the full time axis if it fits in one tile.
    if time_tile is None:
        tgt = (4 * 1024 * 1024) // max(1, C * itemsize)
    else:
        tgt = int(time_tile)
    tgt = max(8, (tgt // 8) * 8)
    Tt = T if T <= tgt else tgt
    grid_t = pl.cdiv(T, Tt)
    needs_mask = (grid_t * Tt != T)

    block_bytes = Tt * C * itemsize
    # 2 inputs x 2 buffers x block + small scratches/outputs, with headroom;
    # stays well inside v7x's 64 MiB VMEM and is tiny on v5e/v6e.
    vmem_limit = int(min(64 * 1024 * 1024,
                         max(8 * 1024 * 1024, 5 * block_bytes + (1 << 20))))

    kernel = functools.partial(
        _diffloss_kernel, threshold=float(threshold), T=T, Tt=Tt,
        inv_count=1.0 / (T - 1), needs_mask=needs_mask)

    cost = pl.CostEstimate(
        flops=int(10 * B * T * C),
        transcendentals=0,
        bytes_accessed=int(2 * B * T * C * itemsize + B * C * 4))

    dl3 = pl.pallas_call(
        kernel,
        out_shape=jax.ShapeDtypeStruct((B, 1, C), jnp.float32),
        grid_spec=pltpu.PrefetchScalarGridSpec(
            num_scalar_prefetch=0,
            grid=(B, grid_t),
            in_specs=[
                pl.BlockSpec((None, Tt, C), lambda b, t: (b, t, 0)),   # pred tile
                pl.BlockSpec((None, Tt, C), lambda b, t: (b, t, 0)),   # true tile
            ],
            out_specs=pl.BlockSpec((None, 1, C), lambda b, t: (b, 0, 0)),  # dl (resident acc)
            scratch_shapes=[
                pltpu.VMEM((1, C), jnp.float32),   # carried last pred row (halo)
                pltpu.VMEM((1, C), jnp.float32),   # carried last true row (halo)
            ],
        ),
        compiler_params=pltpu.CompilerParams(
            dimension_semantics=("parallel", "arbitrary"),
            vmem_limit_bytes=vmem_limit,
        ),
        cost_estimate=cost,
    )(pred, true)

    dl = dl3.reshape(B, C)
    wdl = w[None, :] * dl     # O(B*C) — done in the wrapper, not the kernel
    return wdl, dl


def _reference(pred, true, w_channel, threshold=0.005):
    pred = pred.astype(jnp.float32)
    true = true.astype(jnp.float32)
    pred_diff = pred[:, 1:, :] - pred[:, :-1, :]
    true_diff = true[:, 1:, :] - true[:, :-1, :]
    ps = jnp.where(pred_diff <= -threshold, -1, jnp.where(pred_diff >= threshold, 1, 0))
    ts = jnp.where(true_diff <= -threshold, -1, jnp.where(true_diff >= threshold, 1, 0))
    diff = jnp.where(ps * ts == -1, 1, 0).astype(jnp.float32)
    dl = diff.mean(axis=1)
    return jnp.einsum('j,ij->ij', w_channel.astype(jnp.float32), dl), dl


if __name__ == "__main__":
    key = jax.random.PRNGKey(0)
    threshold = 0.005

    # --- Test 1: small shapes matching the module's intended use -------------
    B, T, C = 2, 8, 4
    k1, k2 = jax.random.split(key)
    pred = jax.random.normal(k1, (B, T, C), dtype=jnp.float32) * 0.05
    true = jax.random.normal(k2, (B, T, C), dtype=jnp.float32) * 0.05

    # DiffLoss.__init__: uniform per-channel weights summing to 1.
    w_channel = jnp.ones((C,), dtype=jnp.float32)
    w_channel = w_channel / jnp.sum(w_channel)

    wdl, dl = diff_loss(pred, true, w_channel, threshold)
    jax.block_until_ready((wdl, dl))
    ref_wdl, ref_dl = _reference(pred, true, w_channel, threshold)
    assert jnp.allclose(wdl, ref_wdl, atol=1e-6)
    assert jnp.allclose(dl, ref_dl, atol=1e-6)

    # --- Test 2: multi time-tile case (exercises halo carry + tail masking) --
    B2, T2, C2 = 2, 1037, 70
    k3, k4 = jax.random.split(k2)
    pred2 = jax.random.normal(k3, (B2, T2, C2), dtype=jnp.float32) * 0.05
    true2 = jax.random.normal(k4, (B2, T2, C2), dtype=jnp.float32) * 0.05
    w2 = jnp.ones((C2,), dtype=jnp.float32)
    w2 = w2 / jnp.sum(w2)

    ref_wdl2, ref_dl2 = _reference(pred2, true2, w2, threshold)

    # Forced small time tile -> 9 time tiles, last one partial (masked rows).
    wdl2, dl2 = diff_loss(pred2, true2, w2, threshold, time_tile=128)
    jax.block_until_ready((wdl2, dl2))
    assert jnp.allclose(wdl2, ref_wdl2, atol=1e-5)
    assert jnp.allclose(dl2, ref_dl2, atol=1e-5)

    # --- Test 3: same data, auto tiling (single full-time tile path) ---------
    wdl3, dl3 = diff_loss(pred2, true2, w2, threshold)
    jax.block_until_ready((wdl3, dl3))
    assert jnp.allclose(wdl3, ref_wdl2, atol=1e-5)
    assert jnp.allclose(dl3, ref_dl2, atol=1e-5)

    print("KERNEL_OK")
</pallas_src>

<mosaic_0001>
module attributes {stable_mosaic.version = 11 : i64} {
  func.func @_diffloss_kernel(%arg0: i32, %arg1: i32, %arg2: memref<1x8x4xf32, #tpu.memory_space<vmem>>, %arg3: memref<1x8x4xf32, #tpu.memory_space<vmem>>, %arg4: memref<1x1x4xf32, #tpu.memory_space<vmem>>, %arg5: memref<1x4xf32, #tpu.memory_space<vmem>>, %arg6: memref<1x4xf32, #tpu.memory_space<vmem>>) attributes {dimension_semantics = [#tpu.dimension_semantics<parallel>, #tpu.dimension_semantics<arbitrary>], iteration_bounds = array<i64: 2, 1>, scalar_prefetch = 0 : i64, scratch_operands = 2 : i64, tpu.core_type = #tpu.core_type<tc>, window_params = [{transform_indices = @transform_0, window_bounds = array<i64: 1, 8, 4>}, {transform_indices = @transform_1, window_bounds = array<i64: 1, 8, 4>}, {transform_indices = @transform_2, window_bounds = array<i64: 1, 1, 4>}]} {
    %c0 = arith.constant 0 : index
    %c0_0 = arith.constant 0 : index
    %c0_1 = arith.constant 0 : index
    %0 = vector.load %arg2[%c0, %c0_0, %c0_1] : memref<1x8x4xf32, #tpu.memory_space<vmem>>, vector<1x8x4xf32>
    %1 = vector.shape_cast %0 : vector<1x8x4xf32> to vector<8x4xf32>
    %c0_2 = arith.constant 0 : index
    %c0_3 = arith.constant 0 : index
    %c0_4 = arith.constant 0 : index
    %2 = vector.load %arg3[%c0_2, %c0_3, %c0_4] : memref<1x8x4xf32, #tpu.memory_space<vmem>>, vector<1x8x4xf32>
    %3 = vector.shape_cast %2 : vector<1x8x4xf32> to vector<8x4xf32>
    %c0_i32 = arith.constant 0 : i32
    %4 = arith.cmpi eq, %arg1, %c0_i32 : i32
    %5 = arith.extui %4 : i1 to i32
    %c0_i32_5 = arith.constant 0 : i32
    %6 = arith.cmpi ne, %5, %c0_i32_5 : i32
    scf.if %6 {
      %cst_28 = arith.constant 0.000000e+00 : f32
      %45 = vector.broadcast %cst_28 : f32 to vector<1x4xf32>
      %c0_29 = arith.constant 0 : index
      %c0_30 = arith.constant 0 : index
      %c0_31 = arith.constant 0 : index
      %46 = vector.load %arg4[%c0_29, %c0_30, %c0_31] : memref<1x1x4xf32, #tpu.memory_space<vmem>>, vector<1x1x4xf32>
      %47 = vector.shape_cast %46 : vector<1x1x4xf32> to vector<1x4xf32>
      %48 = vector.shape_cast %45 : vector<1x4xf32> to vector<1x1x4xf32>
      tpu.vector_store %arg4[%c0_29, %c0_30, %c0_31], %48 {strides = array<i32>} : memref<1x1x4xf32, #tpu.memory_space<vmem>>, vector<1x1x4xf32>,
      %49 = vector.extract_strided_slice %1 {offsets = [0, 0], sizes = [1, 4], strides = [1, 1]} : vector<8x4xf32> to vector<1x4xf32>
      %c0_32 = arith.constant 0 : index
      %c0_33 = arith.constant 0 : index
      %50 = vector.load %arg5[%c0_32, %c0_33] : memref<1x4xf32, #tpu.memory_space<vmem>>, vector<1x4xf32>
      tpu.vector_store %arg5[%c0_32, %c0_33], %49 {strides = array<i32>} : memref<1x4xf32, #tpu.memory_space<vmem>>, vector<1x4xf32>,
      %51 = vector.extract_strided_slice %3 {offsets = [0, 0], sizes = [1, 4], strides = [1, 1]} : vector<8x4xf32> to vector<1x4xf32>
      %c0_34 = arith.constant 0 : index
      %c0_35 = arith.constant 0 : index
      %52 = vector.load %arg6[%c0_34, %c0_35] : memref<1x4xf32, #tpu.memory_space<vmem>>, vector<1x4xf32>
      tpu.vector_store %arg6[%c0_34, %c0_35], %51 {strides = array<i32>} : memref<1x4xf32, #tpu.memory_space<vmem>>, vector<1x4xf32>,
    } else {
    }
    %c0_6 = arith.constant 0 : index
    %c0_7 = arith.constant 0 : index
    %7 = vector.load %arg5[%c0_6, %c0_7] : memref<1x4xf32, #tpu.memory_space<vmem>>, vector<1x4xf32>
    %8 = vector.extract_strided_slice %1 {offsets = [0, 0], sizes = [7, 4], strides = [1, 1]} : vector<8x4xf32> to vector<7x4xf32>
    %9 = tpu.concatenate %7, %8 in 0 : vector<1x4xf32>, vector<7x4xf32> -> vector<8x4xf32>
    %c0_8 = arith.constant 0 : index
    %c0_9 = arith.constant 0 : index
    %10 = vector.load %arg6[%c0_8, %c0_9] : memref<1x4xf32, #tpu.memory_space<vmem>>, vector<1x4xf32>
    %11 = vector.extract_strided_slice %3 {offsets = [0, 0], sizes = [7, 4], strides = [1, 1]} : vector<8x4xf32> to vector<7x4xf32>
    %12 = tpu.concatenate %10, %11 in 0 : vector<1x4xf32>, vector<7x4xf32> -> vector<8x4xf32>
    %13 = arith.subf %1, %9 : vector<8x4xf32>
    %14 = arith.subf %3, %12 : vector<8x4xf32>
    %cst = arith.constant 5.000000e-03 : f32
    %15 = vector.broadcast %cst : f32 to vector<8x4xf32>
    %16 = arith.cmpf oge, %13, %15 : vector<8x4xf32>
    %cst_10 = arith.constant 0.000000e+00 : f32
    %cst_11 = arith.constant 5.000000e-03 : f32
    %17 = arith.subf %cst_10, %cst_11 : f32
    %18 = vector.broadcast %17 : f32 to vector<8x4xf32>
    %19 = arith.cmpf ole, %14, %18 : vector<8x4xf32>
    %20 = arith.andi %16, %19 : vector<8x4xi1>
    %cst_12 = arith.constant 0.000000e+00 : f32
    %cst_13 = arith.constant 5.000000e-03 : f32
    %21 = arith.subf %cst_12, %cst_13 : f32
    %22 = vector.broadcast %21 : f32 to vector<8x4xf32>
    %23 = arith.cmpf ole, %13, %22 : vector<8x4xf32>
    %cst_14 = arith.constant 5.000000e-03 : f32
    %24 = vector.broadcast %cst_14 : f32 to vector<8x4xf32>
    %25 = arith.cmpf oge, %14, %24 : vector<8x4xf32>
    %26 = arith.andi %23, %25 : vector<8x4xi1>
    %27 = arith.ori %20, %26 : vector<8x4xi1>
    %c0_15 = arith.constant 0 : index
    %c0_16 = arith.constant 0 : index
    %c0_17 = arith.constant 0 : index
    %28 = vector.load %arg4[%c0_15, %c0_16, %c0_17] : memref<1x1x4xf32, #tpu.memory_space<vmem>>, vector<1x1x4xf32>
    %29 = vector.shape_cast %28 : vector<1x1x4xf32> to vector<1x4xf32>
    %30 = arith.extui %27 : vector<8x4xi1> to vector<8x4xi32>
    %31 = arith.sitofp %30 : vector<8x4xi32> to vector<8x4xf32>
    %cst_18 = arith.constant dense<0.000000e+00> : vector<4xf32>
    %32 = vector.multi_reduction <add>, %31, %cst_18 [0] : vector<8x4xf32> to vector<4xf32>
    %33 = vector.shape_cast %32 : vector<4xf32> to vector<1x4xf32>
    %34 = arith.addf %29, %33 : vector<1x4xf32>
    %c0_19 = arith.constant 0 : index
    %c0_20 = arith.constant 0 : index
    %c0_21 = arith.constant 0 : index
    %35 = vector.load %arg4[%c0_19, %c0_20, %c0_21] : memref<1x1x4xf32, #tpu.memory_space<vmem>>, vector<1x1x4xf32>
    %36 = vector.shape_cast %35 : vector<1x1x4xf32> to vector<1x4xf32>
    %37 = vector.shape_cast %34 : vector<1x4xf32> to vector<1x1x4xf32>
    tpu.vector_store %arg4[%c0_19, %c0_20, %c0_21], %37 {strides = array<i32>} : memref<1x1x4xf32, #tpu.memory_space<vmem>>, vector<1x1x4xf32>,
    %38 = vector.extract_strided_slice %1 {offsets = [7, 0], sizes = [1, 4], strides = [1, 1]} : vector<8x4xf32> to vector<1x4xf32>
    %c0_22 = arith.constant 0 : index
    %c0_23 = arith.constant 0 : index
    %39 = vector.load %arg5[%c0_22, %c0_23] : memref<1x4xf32, #tpu.memory_space<vmem>>, vector<1x4xf32>
    tpu.vector_store %arg5[%c0_22, %c0_23], %38 {strides = array<i32>} : memref<1x4xf32, #tpu.memory_space<vmem>>, vector<1x4xf32>,
    %40 = vector.extract_strided_slice %3 {offsets = [7, 0], sizes = [1, 4], strides = [1, 1]} : vector<8x4xf32> to vector<1x4xf32>
    %c0_24 = arith.constant 0 : index
    %c0_25 = arith.constant 0 : index
    %41 = vector.load %arg6[%c0_24, %c0_25] : memref<1x4xf32, #tpu.memory_space<vmem>>, vector<1x4xf32>
    tpu.vector_store %arg6[%c0_24, %c0_25], %40 {strides = array<i32>} : memref<1x4xf32, #tpu.memory_space<vmem>>, vector<1x4xf32>,
    %c0_i32_26 = arith.constant 0 : i32
    %42 = arith.cmpi eq, %arg1, %c0_i32_26 : i32
    %43 = arith.extui %42 : i1 to i32
    %c0_i32_27 = arith.constant 0 : i32
    %44 = arith.cmpi ne, %43, %c0_i32_27 : i32
    scf.if %44 {
      %c0_28 = arith.constant 0 : index
      %c0_29 = arith.constant 0 : index
      %c0_30 = arith.constant 0 : index
      %45 = vector.load %arg4[%c0_28, %c0_29, %c0_30] : memref<1x1x4xf32, #tpu.memory_space<vmem>>, vector<1x1x4xf32>
      %46 = vector.shape_cast %45 : vector<1x1x4xf32> to vector<1x4xf32>
      %cst_31 = arith.constant 0.142857149 : f32
      %47 = vector.broadcast %cst_31 : f32 to vector<1x4xf32>
      %48 = arith.mulf %46, %47 : vector<1x4xf32>
      %c0_32 = arith.constant 0 : index
      %c0_33 = arith.constant 0 : index
      %c0_34 = arith.constant 0 : index
      %49 = vector.load %arg4[%c0_32, %c0_33, %c0_34] : memref<1x1x4xf32, #tpu.memory_space<vmem>>, vector<1x1x4xf32>
      %50 = vector.shape_cast %49 : vector<1x1x4xf32> to vector<1x4xf32>
      %51 = vector.shape_cast %48 : vector<1x4xf32> to vector<1x1x4xf32>
      tpu.vector_store %arg4[%c0_32, %c0_33, %c0_34], %51 {strides = array<i32>} : memref<1x1x4xf32, #tpu.memory_space<vmem>>, vector<1x1x4xf32>,
    } else {
    }
    return
  }
  func.func @transform_0(%arg0: i32, %arg1: i32) -> (i32, i32, i32) {
    %c0_i32 = arith.constant 0 : i32
    %c0_i32_0 = arith.constant 0 : i32
    return %arg0, %arg1, %c0_i32 : i32, i32, i32
  }
  func.func @transform_1(%arg0: i32, %arg1: i32) -> (i32, i32, i32) {
    %c0_i32 = arith.constant 0 : i32
    %c0_i32_0 = arith.constant 0 : i32
    return %arg0, %arg1, %c0_i32 : i32, i32, i32
  }
  func.func @transform_2(%arg0: i32, %arg1: i32) -> (i32, i32, i32) {
    %c0_i32 = arith.constant 0 : i32
    %c0_i32_0 = arith.constant 0 : i32
    %c0_i32_1 = arith.constant 0 : i32
    return %arg0, %c0_i32, %c0_i32_0 : i32, i32, i32
  }
}

</mosaic_0001>

<bundles_post_ra>
// kernel: tpu_custom_call.1
= control target key start
LH: loop header
LB: loop body
LE: loop exit
PB: predicated region body
PF: predicated region fallthrough
CT: control target
= control target key end

     0   :  { %7 = vsyncpa [#allocation5], 0  ;;  %s615_s0 = inlined_call_operand.vmem [shape: f32[2,8,4], index: 0, kind: input, shape index: {}]   ;;  %s616_s1 = inlined_call_operand.vmem [shape: f32[2,8,4], index: 1, kind: input, shape index: {}]   ;;  %s617_s2 = inlined_call_operand.hbm [shape: f32[2,1,4], index: 2, kind: output, shape index: {}]  }
   0x1   :  { %9 = vsyncpa [#allocation5 + $0x1], 0  ;;  %s498_s9 = smov 0   ;;  %s500_s10 = smov 0  }
   0x2   :  { %s502_s11 = smov 0   ;;  %s504_s12 = smov 0  }
   0x3   :  { %s506_s13 = smov 0   ;;  %s508_s14 = smov 0  }
   0x4 LB: > { %s336_s15 = sadd.s32 4294967295, %s480_s14   ;;  %s337_s16 = sadd.s32 4294967294, %s480_s14   ;;  %s480_s14 = sphi %s508_s14, %s15_s14   ;;  %s476_s13 = sphi %s506_s13, %s624_s13   ;;  %s472_s12 = sphi %s504_s12, %s623_s12   ;;  %s468_s11 = sphi %s502_s11, %s622_s11   ;;  %s464_s10 = sphi %s500_s10, %s621_s10   ;;  %s460_s9 = sphi %s498_s9, %s620_s9  }
   0x5   : > { %s27_s17 = sadd.s32 1, %s476_s13  ;;  %s90_s18 = sadd.s32 1, %s468_s11 }
   0x6   : > { %p29_p0 = scmp.ge.s32.totalorder %s27_s17, 2  ;;  %p100_p1 = scmp.ne.s32.totalorder %s468_s11, %s464_s10 }
   0x7   : > { %p101_p2 = scmp.eq.s32.totalorder %s336_s15, 1  ;;  %p106_p3 = scmp.ne.s32.totalorder %s464_s10, %s460_s9 }
   0x8   : > { %s626_s17 = smov (%p29_p0, %s27_s17), 0  ;;  %p107_p5 = scmp.eq.s32.totalorder %s337_s16, 1 }
   0x9   : > { %p538_p4 = por %p101_p2, %p100_p1  ;;  %s87_s20 = ssub.s32 %s476_s13, %s626_s17 }
   0xa   : > { %p340_p6 = scmp.ge.s32.totalorder %s480_s14, 1  ;;  %p88_p7 = scmp.eq.s32.totalorder %s87_s20, 0 }
   0xb   : > { %p545_p8 = por %p107_p5, %p106_p3  ;;  %p145_p9 = scmp.lt.s32.totalorder %s480_s14, 3 }
   0xc   : > { %s551_s22 = scalar_select %p88_p7, %s468_s11, %s90_s18  }
   0xd   : > { %p146_p10 = pnand %p340_p6, %p145_p9 }
   0xe   : > { %p175_p11 = scmp.lt.s32.totalorder (!%p146_p10), %s472_s12, 1  ;;  %s173_s23 = sand.u32 (!%p146_p10), 1, %s464_s10  }
   0xf   : > { %149 = sbr.rel (%p146_p10) target bundleno = 70 (0x46), region = 28  ;;  %s558_s25 = scalar_lea.vmem (!%p146_p10), [#allocation4], %s173_s23 }
  0x10   : > { %s251_s7 = scalar_lea.hbm (!%p146_p10), %s617_s2, %s472_s12  ;;  %s253_s8 = sshll.u32 (!%p146_p10), %s558_s25, 4  ;;  %s254_s8 = int_to_ptr.vmem [resolvable:$true] %s253_s8 }
  0x11   : > { %s255_s15 = sshll.u32 (!%p146_p10), %s251_s7, 4  ;;  %s243_s16 = scalar_lea.sflag (!%p146_p10), [#allocation5], %s173_s23  ;;  %s256_s15 = int_to_ptr.hbm [resolvable:$true] %s255_s15 }
  0x12   : > { %s416_s18 = sshra.s32 (!%p146_p10), %s256_s15, 4  ;;  %s417_s18 = int_to_ptr.hbm [resolvable:$true] %s416_s18 }
  0x13   : > { %s418_s20 = scalar_lea.hbm (!%p146_p10), %s417_s18, 1  ;;  %p423_p1 = scmp.lt.s32.totalorder (!%p146_p10), %s417_s18, %s617_s2 }
  0x14   : > { %vm195_vm0 = vcmask 24576   ;;  %s176_s24 = scalar_select %p175_p11, %s472_s12, 1  ;;  %v482_v0 = vmov 0.0   ;;  %vm203_vm1 = vcmask 1040384   ;;  %vm233_vm2 = vcmask 31751  }
  0x15   : > { %196 = vst.msk [vmem:[%s558_s25] sm:$0x1] %vm195_vm0, %v482_v0  ;;  %vm222_vm9 = vcmask 31744   ;;  %p419_p12 = scmp.ne.s32.totalorder %s417_s18, %s418_s20  ;;  %s422_s12 = scalar_lea.hbm %s617_s2, 2 }
  0x16   : > { %s341_s26 = sshll.u32 %s176_s24, 3  ;;  %p424_p2 = scmp.lt.s32.totalorder %s422_s12, %s418_s20 }
  0x17   : > { %s181_s29 = scalar_lea.vmem %s615_s0, %s341_s26  ;;  %s188_s4 = scalar_lea.vmem %s616_s1, %s341_s26 }
  0x18   : > { %v189_v1 = vld [vmem:[%s181_s29] sm:$0xff]  ;;  %p420_p13 = pnand %p419_p12, %p538_p4  ;;  %p425_p3 = por %p424_p2, %p423_p1 }
  0x19   : > { %v190_v2 = vld [vmem:[%s188_s4] sm:$0xff]  ;;  %197 = vst.msk [vmem:[#allocation2] sm:$0x1] %vm195_vm0, %v189_v1  ;;  %v201_v3 = vrot.slane %v189_v1, 7 }
  0x1a   : > { %198 = vst.msk [vmem:[#allocation3] sm:$0x1] %vm195_vm0, %v190_v2  ;;  %v207_v4 = vrot.slane %v190_v2, 7  ;;  %p421_p0 = pneg %p420_p13 }
  0x1c   : > { %v219_v18 = vld [vmem:[%s558_s25] sm:$0x1]  ;;  %p426_p5 = pnand %p425_p3, %p421_p0 }
  0x20   : > { %v199_v5 = vld [vmem:[#allocation2] sm:$0x1] }
  0x21   : > { %v204_v6 = vsel %vm203_vm1, %v199_v5, %v201_v3  ;;  %v205_v7 = vld [vmem:[#allocation3] sm:$0x1]  ;;  %234 = vst.msk [vmem:[#allocation2 - $0x7] sm:$0x80] %vm233_vm2, %v189_v1 }
  0x22   : > { %v210_v8 = vsub.f32 %v189_v1, %v204_v6  ;;  %v209_v9 = vsel %vm203_vm1, %v205_v7, %v207_v4  ;;  %235 = vst.msk [vmem:[#allocation3 - $0x7] sm:$0x80] %vm233_vm2, %v190_v2 }
  0x23   : > { %v211_v10 = vsub.f32 %v190_v2, %v209_v9 }
  0x24   : > { %vm212_vm3 = vcmp.ge.f32.partialorder %v210_v8, 0.005  ;;  %vm215_vm4 = vcmp.le.f32.partialorder %v210_v8, -0.005 }
  0x25   : > { %vm213_vm5 = vcmp.le.f32.partialorder %v211_v10, -0.005  ;;  %vm216_vm6 = vcmp.ge.f32.partialorder %v211_v10, 0.005 }
  0x26   : > { %vm214_vm7 = vmand %vm212_vm3, %vm213_vm5 }
  0x27   : > { %vm217_vm8 = vmand %vm215_vm4, %vm216_vm6 }
  0x28   : > { %vm218_vm10 = vmor %vm214_vm7, %vm217_vm8 }
  0x29   : > { %v343_v11 = vsel %vm218_vm10, 1.0, %v482_v0 }
  0x2a   : > { %v223_v12 = vsel %vm222_vm9, %v343_v11, 0.0 }
  0x2b   : > { %v224_v13 = vrot.slane %v223_v12, 4 }
  0x2d   : > { %v225_v14 = vadd.f32 %v224_v13, %v223_v12 }
  0x2f   : > { %v226_v15 = vrot.slane %v225_v14, 2 }
  0x31   : > { %v227_v16 = vadd.f32 %v226_v15, %v225_v14 }
  0x33   : > { %v228_v17 = vrot.slane %v227_v16, 1 }
  0x35   : > { %v229_v19 = vadd.f32 %v228_v17, %v227_v16 }
  0x37   : > { %v230_v20 = vadd.f32 %v229_v19, %v219_v18 }
  0x39   : > { %232 = vst.msk [vmem:[%s558_s25] sm:$0x1] %vm195_vm0, %v230_v20 }
  0x40   : > { %v239_v21 = vld [vmem:[%s558_s25] sm:$0x1] }
  0x41   : > { %v240_v22 = vmul.f32 0.14285715, %v239_v21 }
  0x43   : > { %241 = vst.msk [vmem:[%s558_s25] sm:$0x1] %vm195_vm0, %v240_v22 }
  0x44   : > { %429 = shalt.err (!%p426_p5)
}
  0x45   : > { %346 = dma.vmem_to_hbm [thread:$0]  (%p538_p4), %s254_s8, 16, %s256_s15, %s243_s16  }
  0x46 PF: > { %p352_p6 = scmp.ge.s32.totalorder %s480_s14, 2  ;;  %s267_s23 = sand.u32 1, %s460_s9  }
  0x47   : > { %s268_s25 = scalar_lea.sflag [#allocation5], %s267_s23 }
  0x48   : > { %p349_p7 = pnand %p352_p6, %p545_p8 }
  0x4a   : > { %p350_p9 = pneg %p349_p7 }
  0x4c   : > { %455 = dma.done.wait (%p350_p9), %s268_s25, 16  }
  0x4d   : > { %457 = vsyncadd (%p350_p9), %s268_s25, 4294967280  ;;  %s15_s14 = sadd.s32 1, %s480_s14   ;;  %s620_s9 = smov %s464_s10 }
  0x4e   : > { %p12_p10 = scmp.ge.s32.totalorder %s15_s14, 4   ;;  %s621_s10 = smov %s468_s11 }
  0x4f   : > { %s622_s11 = smov %s551_s22  ;;  %s623_s12 = smov %s476_s13 }
  0x50   : > { %s624_s13 = smov %s626_s17  ;;  %14 = sbr.rel (!%p12_p10) target bundleno = 4 (0x4), region = 74 }
  0x55   :  { %273 = vsyncpa [#allocation5], 1 }
  0x56   :  { %275 = vsyncpa [#allocation5 + $0x1], 1 }

</bundles_post_ra>
